<compile_context>
chip_gen: v7x
topology: tpu7x:2x2x1
jax: 0.10.0
libtpu: 0.0.40
codegen_flags: <defaults>
</compile_context>

<pallas_src>
import functools

import jax
import jax.numpy as jnp
import numpy as np
from jax.experimental import pallas as pl
from jax.experimental.pallas import tpu as pltpu


def _pair(v):
    return tuple(v) if isinstance(v, (tuple, list)) else (v, v)


def _quadruple(v):
    return tuple(v) if isinstance(v, (tuple, list)) else (v, v, v, v)


def _resolve_padding(h, w, kh, kw, sh, sw, padding, same):
    """Returns (pad_l, pad_r, pad_t, pad_b), matching MedianPool2d._padding."""
    if same:
        ph = max(kh - sh, 0) if h % sh == 0 else max(kh - h % sh, 0)
        pw = max(kw - sw, 0) if w % sw == 0 else max(kw - w % sw, 0)
        pad_l = pw // 2
        pad_r = pw - pad_l
        pad_t = ph // 2
        pad_b = ph - pad_t
        return pad_l, pad_r, pad_t, pad_b
    return _quadruple(padding)


# ---------------------------------------------------------------------------
# Kernels
# ---------------------------------------------------------------------------

def _sort3(a, b, c):
    """Full 3-element sort (3 compare-exchanges, 6 min/max ops): lo <= me <= hi."""
    t0 = jnp.minimum(a, b)
    t1 = jnp.maximum(a, b)
    t2 = jnp.minimum(t1, c)
    hi = jnp.maximum(t1, c)
    lo = jnp.minimum(t0, t2)
    me = jnp.maximum(t0, t2)
    return lo, me, hi


def _med3(a, b, c):
    """Exact median of 3 (4 min/max ops)."""
    return jnp.maximum(jnp.minimum(a, b), jnp.minimum(jnp.maximum(a, b), c))


def _median3x3_kernel(x_ref, o_ref):
    """3x3 stride-1 median via shared column sorts (exact Smith decomposition).

    x_ref: (1, cb, hb + 2, Wp) reflect-padded rows; o_ref: (1, cb, hb, ow), ow = Wp - 2.
    The vertical sort3 is computed once per padded column and reused by the three
    horizontally adjacent windows; per-pixel cost ~18 VALU ops vs ~34 for a per-pixel
    19-CE med9 network.  min/max is exact for f32/bf16, so results match torch.median
    for finite inputs (NaN ordering differs -- see wrapper docstring).
    """
    hb = o_ref.shape[2]
    ow = o_ref.shape[3]

    # Vertical 3-tap column sort (sublane-offset ref slices).
    a = x_ref[0, :, 0:hb, :]
    b = x_ref[0, :, 1:hb + 1, :]
    c = x_ref[0, :, 2:hb + 2, :]
    lo, me, hi = _sort3(a, b, c)  # (cb, hb, Wp) each

    # TODO(synk): the three W-offset reads below are lane-offset value slices; a
    # pltpu.roll-based variant would move the shifts onto the idle XLU slot once roll
    # lowering at non-multiple-of-128 lane widths is validated on HW.
    def w3(v):
        return v[:, :, 0:ow], v[:, :, 1:1 + ow], v[:, :, 2:2 + ow]

    lo0, lo1, lo2 = w3(lo)
    me0, me1, me2 = w3(me)
    hi0, hi1, hi2 = w3(hi)

    mx_lo = jnp.maximum(jnp.maximum(lo0, lo1), lo2)   # max of column minima
    md_me = _med3(me0, me1, me2)                      # median of column medians
    mn_hi = jnp.minimum(jnp.minimum(hi0, hi1), hi2)   # min of column maxima
    o_ref[0, :, :, :] = _med3(mx_lo, md_me, mn_hi).astype(o_ref.dtype)


def _lower_median_selection(taps):
    """Lower median (torch.median semantics) of a list of equal-shaped arrays.

    Pruned partial-bubble selection: (n-1-m) max-to-tail passes pin positions
    m+1..n-1; the lower median is then the max of the surviving prefix.
    TODO(synk): replace with a true median-selection network (e.g. ~99-CE median-of-25)
    for another ~2x on the binding VALU slot at k=5.
    """
    p = list(taps)
    n = len(p)
    m = (n - 1) // 2
    for t in range(n - 1 - m):
        for j in range(n - 1 - t):
            lo = jnp.minimum(p[j], p[j + 1])
            hi = jnp.maximum(p[j], p[j + 1])
            p[j], p[j + 1] = lo, hi
    out = p[0]
    for j in range(1, m + 1):
        out = jnp.maximum(out, p[j])
    return out


def _median_generic_kernel(x_ref, o_ref, *, kh, kw):
    """Generic k x k stride-1 lower-median (used for kernel_size != 3)."""
    oh = o_ref.shape[2]
    ow = o_ref.shape[3]
    taps = [x_ref[0, :, di:di + oh, dj:dj + ow]
            for di in range(kh) for dj in range(kw)]
    o_ref[0, :, :, :] = _lower_median_selection(taps).astype(o_ref.dtype)


# ---------------------------------------------------------------------------
# Block planning (chip-derived VMEM budget, channel blocking, H chunking)
# ---------------------------------------------------------------------------

def _chip_vmem_capacity_bytes():
    # TODO(synk): also branch on chip generation (on v5e, upcasting bf16 to f32 for the
    # compare network avoids the unpack->f32->pack penalty of its non-bf16 VALUs).
    try:
        cap = getattr(pltpu.get_tpu_info(), "vmem_capacity_bytes", None)
        if cap:
            return int(cap)
    except Exception:
        pass
    return 64 * 1024 * 1024  # conservative fallback: smallest per-core VMEM (v7x)


def _vmem_budget_and_limit(block_budget_override=None):
    cap = _chip_vmem_capacity_bytes()
    # Per-step block budget (double-buffered in/out + live slab temporaries) with
    # headroom for Mosaic internal scratch: ~28 MiB on 128 MiB parts (v5e/v6e),
    # ~16 MiB on v7x (64 MiB VMEM).
    budget = min(cap // 4, 28 * 1024 * 1024)
    if block_budget_override is not None:
        budget = int(block_budget_override)
    limit = min(cap * 3 // 4, 3 * budget + 16 * 1024 * 1024)
    limit = max(limit, 32 * 1024 * 1024)
    return budget, int(limit)


def _plan_blocks(n, c, hp, wp, oh, ow, itemsize, kh, kw, budget):
    """Choose (cb, hb): channels per block and output rows per (wrapper) H chunk."""
    halo = kh - 1
    live = 8 if (kh, kw) == (3, 3) else kh * kw + 6  # live slab-sized temporaries

    def footprint(cb, hb):
        return itemsize * cb * (2 * (hb + halo) * wp + 2 * hb * ow + live * hb * wp)

    divisors = [d for d in range(c, 0, -1) if c % d == 0]
    if n == 1 and c > 1:
        # keep >= 2 grid steps so a second TensorCore (v7x megacore) always has work
        divisors = [d for d in divisors if d < c]

    for cb in divisors:
        if footprint(cb, oh) <= budget:
            return cb, oh  # full-height blocks, single pallas_call

    # Plane too large for a full-height block: tile H in the wrapper (halo'd chunks).
    per_row = itemsize * (2 * wp + 2 * ow + live * wp)
    fixed = itemsize * 2 * halo * wp
    hb = (budget - fixed) // per_row if budget > fixed else 1
    hb = max(8, min(oh, int(hb)))
    for cb in divisors:
        if footprint(cb, hb) <= budget:
            return cb, hb
    return divisors[-1], hb


def _pallas_median(xp_c, cb, kh, kw, vmem_limit_bytes):
    """One pallas_call over a (N, C, Hp_chunk, Wp) reflect-padded slab."""
    n, c, hpc, wpc = xp_c.shape
    oh_c = hpc - kh + 1
    ow = wpc - kw + 1
    if (kh, kw) == (3, 3):
        kernel = _median3x3_kernel
    else:
        kernel = functools.partial(_median_generic_kernel, kh=kh, kw=kw)
    # Layout note: NCHW keeps W on lanes, which is lane-dense for the module's real
    # inputs (flow/image planes, W >= 128) and strictly better than channels-on-lanes
    # for its small channel counts (C in {1..4}).
    return pl.pallas_call(
        kernel,
        out_shape=jax.ShapeDtypeStruct((n, c, oh_c, ow), xp_c.dtype),
        grid_spec=pltpu.PrefetchScalarGridSpec(
            num_scalar_prefetch=0,
            grid=(n, c // cb),
            in_specs=[pl.BlockSpec((1, cb, hpc, wpc), lambda i, j: (i, j, 0, 0))],
            out_specs=pl.BlockSpec((1, cb, oh_c, ow), lambda i, j: (i, j, 0, 0)),
        ),
        compiler_params=pltpu.CompilerParams(
            dimension_semantics=("parallel", "parallel"),
            vmem_limit_bytes=int(vmem_limit_bytes),
        ),
    )(xp_c)


# ---------------------------------------------------------------------------
# Public wrapper
# ---------------------------------------------------------------------------

@functools.partial(
    jax.jit,
    static_argnames=("kernel_size", "stride", "padding", "same", "block_budget_bytes"))
def median_pool_2d(x, kernel_size=3, stride=1, padding=1, same=False,
                   block_budget_bytes=None):
    """JAX/Pallas equivalent of MedianPool2d.forward (NCHW input).

    Matches the PyTorch module exactly for finite inputs.  NOTE: NaN handling differs
    from torch.median (jnp.minimum/maximum propagate NaN; torch sorts NaN last).
    """
    kh, kw = _pair(kernel_size)
    sh, sw = _pair(stride)
    # TODO(synk): only stride=(1,1) (the module default / median-filter use) is
    # implemented in the Pallas kernel.
    assert (sh, sw) == (1, 1), "Pallas kernel implements stride=1 only"

    n, c, h, w = x.shape
    pad_l, pad_r, pad_t, pad_b = _resolve_padding(h, w, kh, kw, sh, sw, padding, same)
    assert pad_t < h and pad_b < h and pad_l < w and pad_r < w, (
        "reflect padding requires pad < spatial dim")

    # Reflect padding (same semantics as F.pad(..., mode='reflect')).
    # TODO(synk): synthesizing the reflected border in-kernel would remove one full HBM
    # round trip of the padded tensor; needs HW validation of lane-dim concat/select
    # lowering, so it is left to a follow-up.
    xp = jnp.pad(x, ((0, 0), (0, 0), (pad_t, pad_b), (pad_l, pad_r)), mode="reflect")
    hp, wp = h + pad_t + pad_b, w + pad_l + pad_r
    oh = (hp - kh) // sh + 1
    ow = (wp - kw) // sw + 1
    assert oh >= 1 and ow >= 1

    budget, vmem_limit = _vmem_budget_and_limit(block_budget_bytes)
    cb, hb = _plan_blocks(n, c, hp, wp, oh, ow, x.dtype.itemsize, kh, kw, budget)

    if hb >= oh:
        return _pallas_median(xp, cb, kh, kw, vmem_limit)

    # Large-plane path: overlapping (hb + kh - 1)-row chunks, one pallas_call each.
    # TODO(synk): an in-call H grid axis with a (kh-1)-row halo (pl.Element offsets or
    # a manual emit_pipeline) would avoid materializing the chunk slices in HBM.
    parts = []
    for r0 in range(0, oh, hb):
        oh_c = min(hb, oh - r0)
        xc = xp[:, :, r0:r0 + oh_c + (kh - 1), :]
        parts.append(_pallas_median(xc, cb, kh, kw, vmem_limit))
    return jnp.concatenate(parts, axis=2)


def median_pool_2d_ref(x, kernel_size=3, stride=1, padding=1, same=False):
    """Pure-JAX reference (mirrors the PyTorch forward; honors `same`)."""
    kh, kw = _pair(kernel_size)
    sh, sw = _pair(stride)
    N, C, H, W = x.shape
    pad_l, pad_r, pad_t, pad_b = _resolve_padding(H, W, kh, kw, sh, sw, padding, same)
    xp = jnp.pad(x, ((0, 0), (0, 0), (pad_t, pad_b), (pad_l, pad_r)), mode="reflect")
    Hp, Wp = xp.shape[2], xp.shape[3]
    oh = (Hp - kh) // sh + 1
    ow = (Wp - kw) // sw + 1
    taps = jnp.stack(
        [
            xp[:, :, di:di + sh * (oh - 1) + 1:sh, dj:dj + sw * (ow - 1) + 1:sw]
            for di in range(kh)
            for dj in range(kw)
        ],
        axis=-1,
    )
    srt = jnp.sort(taps, axis=-1)
    return srt[..., (kh * kw - 1) // 2]


if __name__ == "__main__":
    key = jax.random.PRNGKey(0)
    k1, k2, k3, k4, k5 = jax.random.split(key, 5)

    # 1) Default module config: kernel_size=3, stride=1, padding=1 (median filter).
    x = jax.random.normal(k1, (2, 4, 16, 16), dtype=jnp.float32)
    out = jax.block_until_ready(median_pool_2d(x, kernel_size=3, stride=1, padding=1))
    ref = median_pool_2d_ref(x, kernel_size=3, stride=1, padding=1)
    np.testing.assert_array_equal(np.asarray(out), np.asarray(ref))

    # 2) Rectangular spatial dims + the `same=True` padding path.
    x2 = jax.random.normal(k2, (2, 4, 12, 20), dtype=jnp.float32)
    out2 = jax.block_until_ready(median_pool_2d(x2, same=True))
    ref2 = median_pool_2d_ref(x2, same=True)
    np.testing.assert_array_equal(np.asarray(out2), np.asarray(ref2))

    # 3) bf16 stays bf16 through the compare network; 5x5 exercises the generic path.
    x3 = jax.random.normal(k3, (1, 4, 16, 16), dtype=jnp.bfloat16)
    out3 = jax.block_until_ready(median_pool_2d(x3, kernel_size=5, padding=2))
    ref3 = median_pool_2d_ref(x3, kernel_size=5, padding=2)
    np.testing.assert_array_equal(np.asarray(out3.astype(jnp.float32)),
                                  np.asarray(ref3.astype(jnp.float32)))

    # 4) Forced-tiny VMEM budget exercises the halo'd H-chunking (large-image) path.
    x4 = jax.random.normal(k4, (1, 2, 40, 24), dtype=jnp.float32)
    out4 = jax.block_until_ready(median_pool_2d(x4, block_budget_bytes=16 * 1024))
    ref4 = median_pool_2d_ref(x4)
    np.testing.assert_array_equal(np.asarray(out4), np.asarray(ref4))

    # 5) Asymmetric 4-tuple padding (l, r, t, b).
    x5 = jax.random.normal(k5, (2, 3, 16, 16), dtype=jnp.float32)
    out5 = jax.block_until_ready(median_pool_2d(x5, padding=(2, 1, 0, 1)))
    ref5 = median_pool_2d_ref(x5, padding=(2, 1, 0, 1))
    np.testing.assert_array_equal(np.asarray(out5), np.asarray(ref5))

    print("KERNEL_OK")
</pallas_src>

<mosaic_0001>
module attributes {stable_mosaic.version = 11 : i64} {
  func.func @_median3x3_kernel(%arg0: i32, %arg1: i32, %arg2: memref<1x4x18x18xf32, #tpu.memory_space<vmem>>, %arg3: memref<1x4x16x16xf32, #tpu.memory_space<vmem>>) attributes {dimension_semantics = [#tpu.dimension_semantics<parallel>, #tpu.dimension_semantics<parallel>], iteration_bounds = array<i64: 2, 1>, scalar_prefetch = 0 : i64, scratch_operands = 0 : i64, tpu.core_type = #tpu.core_type<tc>, window_params = [{transform_indices = @transform_0, window_bounds = array<i64: 1, 4, 18, 18>}, {transform_indices = @transform_1, window_bounds = array<i64: 1, 4, 16, 16>}]} {
    %c0 = arith.constant 0 : index
    %c0_0 = arith.constant 0 : index
    %c0_1 = arith.constant 0 : index
    %c0_2 = arith.constant 0 : index
    %0 = vector.load %arg2[%c0, %c0_0, %c0_1, %c0_2] : memref<1x4x18x18xf32, #tpu.memory_space<vmem>>, vector<1x4x16x18xf32>
    %1 = vector.shape_cast %0 : vector<1x4x16x18xf32> to vector<4x16x18xf32>
    %c0_3 = arith.constant 0 : index
    %c0_4 = arith.constant 0 : index
    %c1 = arith.constant 1 : index
    %c0_5 = arith.constant 0 : index
    %2 = vector.load %arg2[%c0_3, %c0_4, %c1, %c0_5] : memref<1x4x18x18xf32, #tpu.memory_space<vmem>>, vector<1x4x16x18xf32>
    %3 = vector.shape_cast %2 : vector<1x4x16x18xf32> to vector<4x16x18xf32>
    %c0_6 = arith.constant 0 : index
    %c0_7 = arith.constant 0 : index
    %c2 = arith.constant 2 : index
    %c0_8 = arith.constant 0 : index
    %4 = vector.load %arg2[%c0_6, %c0_7, %c2, %c0_8] : memref<1x4x18x18xf32, #tpu.memory_space<vmem>>, vector<1x4x16x18xf32>
    %5 = vector.shape_cast %4 : vector<1x4x16x18xf32> to vector<4x16x18xf32>
    %6 = arith.minimumf %1, %3 : vector<4x16x18xf32>
    %7 = arith.maximumf %1, %3 : vector<4x16x18xf32>
    %8 = arith.minimumf %7, %5 : vector<4x16x18xf32>
    %9 = arith.maximumf %7, %5 : vector<4x16x18xf32>
    %10 = arith.minimumf %6, %8 : vector<4x16x18xf32>
    %11 = arith.maximumf %6, %8 : vector<4x16x18xf32>
    %12 = vector.extract_strided_slice %10 {offsets = [0, 0, 0], sizes = [4, 16, 16], strides = [1, 1, 1]} : vector<4x16x18xf32> to vector<4x16x16xf32>
    %13 = vector.extract_strided_slice %10 {offsets = [0, 0, 1], sizes = [4, 16, 16], strides = [1, 1, 1]} : vector<4x16x18xf32> to vector<4x16x16xf32>
    %14 = vector.extract_strided_slice %10 {offsets = [0, 0, 2], sizes = [4, 16, 16], strides = [1, 1, 1]} : vector<4x16x18xf32> to vector<4x16x16xf32>
    %15 = vector.extract_strided_slice %11 {offsets = [0, 0, 0], sizes = [4, 16, 16], strides = [1, 1, 1]} : vector<4x16x18xf32> to vector<4x16x16xf32>
    %16 = vector.extract_strided_slice %11 {offsets = [0, 0, 1], sizes = [4, 16, 16], strides = [1, 1, 1]} : vector<4x16x18xf32> to vector<4x16x16xf32>
    %17 = vector.extract_strided_slice %11 {offsets = [0, 0, 2], sizes = [4, 16, 16], strides = [1, 1, 1]} : vector<4x16x18xf32> to vector<4x16x16xf32>
    %18 = vector.extract_strided_slice %9 {offsets = [0, 0, 0], sizes = [4, 16, 16], strides = [1, 1, 1]} : vector<4x16x18xf32> to vector<4x16x16xf32>
    %19 = vector.extract_strided_slice %9 {offsets = [0, 0, 1], sizes = [4, 16, 16], strides = [1, 1, 1]} : vector<4x16x18xf32> to vector<4x16x16xf32>
    %20 = vector.extract_strided_slice %9 {offsets = [0, 0, 2], sizes = [4, 16, 16], strides = [1, 1, 1]} : vector<4x16x18xf32> to vector<4x16x16xf32>
    %21 = arith.maximumf %12, %13 : vector<4x16x16xf32>
    %22 = arith.maximumf %21, %14 : vector<4x16x16xf32>
    %23 = arith.minimumf %15, %16 : vector<4x16x16xf32>
    %24 = arith.maximumf %15, %16 : vector<4x16x16xf32>
    %25 = arith.minimumf %24, %17 : vector<4x16x16xf32>
    %26 = arith.maximumf %23, %25 : vector<4x16x16xf32>
    %27 = arith.minimumf %18, %19 : vector<4x16x16xf32>
    %28 = arith.minimumf %27, %20 : vector<4x16x16xf32>
    %29 = arith.minimumf %22, %26 : vector<4x16x16xf32>
    %30 = arith.maximumf %22, %26 : vector<4x16x16xf32>
    %31 = arith.minimumf %30, %28 : vector<4x16x16xf32>
    %32 = arith.maximumf %29, %31 : vector<4x16x16xf32>
    %c0_9 = arith.constant 0 : index
    %c0_10 = arith.constant 0 : index
    %c0_11 = arith.constant 0 : index
    %c0_12 = arith.constant 0 : index
    %33 = vector.load %arg3[%c0_9, %c0_10, %c0_11, %c0_12] : memref<1x4x16x16xf32, #tpu.memory_space<vmem>>, vector<1x4x16x16xf32>
    %34 = vector.shape_cast %33 : vector<1x4x16x16xf32> to vector<4x16x16xf32>
    %35 = vector.shape_cast %32 : vector<4x16x16xf32> to vector<1x4x16x16xf32>
    tpu.vector_store %arg3[%c0_9, %c0_10, %c0_11, %c0_12], %35 {strides = array<i32>} : memref<1x4x16x16xf32, #tpu.memory_space<vmem>>, vector<1x4x16x16xf32>,
    return
  }
  func.func @transform_0(%arg0: i32, %arg1: i32) -> (i32, i32, i32, i32) {
    %c0_i32 = arith.constant 0 : i32
    %c0_i32_0 = arith.constant 0 : i32
    %c0_i32_1 = arith.constant 0 : i32
    return %arg0, %arg1, %c0_i32, %c0_i32_0 : i32, i32, i32, i32
  }
  func.func @transform_1(%arg0: i32, %arg1: i32) -> (i32, i32, i32, i32) {
    %c0_i32 = arith.constant 0 : i32
    %c0_i32_0 = arith.constant 0 : i32
    %c0_i32_1 = arith.constant 0 : i32
    return %arg0, %arg1, %c0_i32, %c0_i32_0 : i32, i32, i32, i32
  }
}

</mosaic_0001>

<bundles_post_ra>
// kernel: median_pool_2d.1
= control target key start
LH: loop header
LB: loop body
LE: loop exit
PB: predicated region body
PF: predicated region fallthrough
CT: control target
= control target key end

     0   :  { %6 = vsyncpa [#allocation3], 0  ;;  %s1215_s0 = inlined_call_operand.vmem [shape: f32[2,4,18,18], index: 0, kind: input, shape index: {}]   ;;  %s1216_s1 = inlined_call_operand.hbm [shape: f32[2,4,16,16], index: 1, kind: output, shape index: {}]  }
   0x1   :  { %8 = vsyncpa [#allocation3 + $0x1], 0  ;;  %s761_s6 = smov 0   ;;  %s763_s7 = smov 0  }
   0x2   :  { %s765_s8 = smov 0   ;;  %s767_s9 = smov 0  }
   0x3   :  { %s769_s10 = smov 0   ;;  %s771_s11 = smov 0  }
   0x4 LB: > { %s593_s12 = sadd.s32 4294967295, %s744_s11   ;;  %s594_s13 = sadd.s32 4294967294, %s744_s11   ;;  %s744_s11 = sphi %s771_s11, %s14_s11   ;;  %s740_s10 = sphi %s769_s10, %s1241_s10   ;;  %s736_s9 = sphi %s767_s9, %s1240_s9   ;;  %s732_s8 = sphi %s765_s8, %s1239_s8   ;;  %s728_s7 = sphi %s763_s7, %s1238_s7   ;;  %s724_s6 = sphi %s761_s6, %s1237_s6  }
   0x5   : > { %s26_s14 = sadd.s32 1, %s740_s10  ;;  %s63_s15 = sadd.s32 1, %s732_s8 }
   0x6   : > { %p28_p0 = scmp.ge.s32.totalorder %s26_s14, 2  ;;  %p73_p1 = scmp.ne.s32.totalorder %s732_s8, %s728_s7 }
   0x7   : > { %p74_p2 = scmp.eq.s32.totalorder %s593_s12, 1  ;;  %p79_p3 = scmp.ne.s32.totalorder %s728_s7, %s724_s6 }
   0x8   : > { %s1243_s14 = smov (%p28_p0, %s26_s14), 0  ;;  %p80_p5 = scmp.eq.s32.totalorder %s594_s13, 1 }
   0x9   : > { %p801_p4 = por %p74_p2, %p73_p1  ;;  %s58_s17 = ssub.s32 %s740_s10, %s1243_s14 }
   0xa   : > { %p597_p6 = scmp.ge.s32.totalorder %s744_s11, 1  ;;  %p61_p7 = scmp.eq.s32.totalorder %s58_s17, 0 }
   0xb   : > { %p808_p8 = por %p80_p5, %p79_p3  ;;  %p112_p9 = scmp.lt.s32.totalorder %s744_s11, 3 }
   0xc   : > { %s814_s19 = scalar_select %p61_p7, %s732_s8, %s63_s15  }
   0xd   : > { %p113_p10 = pnand %p597_p6, %p112_p9 }
   0xf   : > { %116 = sbr.rel (%p113_p10) target bundleno = 265 (0x109), region = 24 }
  0x16   : > { %p138_p11 = scmp.lt.s32.totalorder %s736_s9, 1  ;;  %s746_s25 = smov 127   ;;  %vm485_vm0 = vcmask 130048  }
  0x17   : > { %s747_s26 = smov 126   ;;  %s134_s27 = sand.u32 1, %s728_s7  }
  0x18   : > { %s139_s20 = scalar_select %p138_p11, %s736_s9, 1 }
  0x19   : > { %s598_s28 = sshll.u32 %s134_s27, 6  ;;  %s605_s30 = sshll.u32 %s736_s9, 10 }
  0x1a   : > { %s606_s21 = smul.u32 96, %s139_s20  ;;  %s1119_s29 = scalar_lea.vmem [#allocation2], %s598_s28 }
  0x1b   : > { %s511_s2 = sshll.u32 %s1119_s29, 4  ;;  %s1159_s5 = scalar_lea.hbm %s1216_s1, %s605_s30  ;;  %s1161_s2 = int_to_ptr.vmem [resolvable:$true] %s511_s2 }
  0x1c   : > { %s821_s24 = scalar_lea.vmem %s1215_s0, %s606_s21  ;;  %s1169_s9 = scalar_lea.sflag [#allocation3], %s134_s27 }
  0x1d   : > { %v151_v0 = vld [vmem:[%s821_s24 + $0x18] sm:$0xff]  ;;  %v149_v5 = vld [vmem:[%s821_s24] sm:$0xff]  ;;  %v150_v16 = vld [vmem:[%s821_s24 + $0x8] sm:$0xff]  ;;  %s666_s12 = scalar_lea.vmem %s1161_s2, 1024  ;;  %s748_s13 = smov [#allocation2]  }
  0x1e   : > { %v159_v1 = vld [vmem:[%s821_s24 + $0x19] sm:$0xff]  ;;  %v157_v6 = vld [vmem:[%s821_s24 + $0x1] sm:$0xff]  ;;  %v158_v17 = vld [vmem:[%s821_s24 + $0x9] sm:$0xff]  ;;  %p667_p12 = scmp.ne.s32.totalorder %s1161_s2, %s666_s12  ;;  %s670_s15 = sshll.u32 %s748_s13, 4  ;;  %s671_s15 = int_to_ptr.vmem [resolvable:$false] %s670_s15 }
  0x1f   : > { %v167_v2 = vld [vmem:[%s821_s24 + $0x1a] sm:$0xff]  ;;  %v826_v3 = vmin.f32 %v151_v0, %v159_v1  ;;  %v183_v4 = vmax.f32 %v151_v0, %v159_v1  ;;  %v165_v7 = vld [vmem:[%s821_s24 + $0x2] sm:$0xff]  ;;  %v831_v8 = vmin.f32 %v149_v5, %v157_v6  ;;  %v181_v9 = vmax.f32 %v149_v5, %v157_v6  ;;  %v843_v18 = vld [vmem:[%s821_s24 + $0xa] sm:$0xff]  ;;  %s672_s17 = scalar_lea.vmem %s671_s15, 2048  ;;  %p673_p1 = scmp.lt.s32.totalorder %s1161_s2, %s671_s15 }
  0x20   : > { %v152_v10 = vld [vmem:[%s821_s24 + $0x20] sm:$0xff]  ;;  %v174_v21 = vmin.f32 %v150_v16, %v158_v17  ;;  %v847_v22 = vmax.f32 %v150_v16, %v158_v17  ;;  %v154_v23 = vld [vmem:[%s821_s24 + $0x38] sm:$0xff]  ;;  %v153_v30 = vld [vmem:[%s821_s24 + $0x30] sm:$0xff]  ;;  %p668_p13 = pnand %p667_p12, %p801_p4  ;;  %p674_p2 = scmp.lt.s32.totalorder %s672_s17, %s666_s12 }
  0x21   : > { %v160_v11 = vld [vmem:[%s821_s24 + $0x21] sm:$0xff]  ;;  %v836_v13 = vmin.f32 %v183_v4, %v167_v2  ;;  %v845_v19 = vmax.f32 %v183_v4, %v167_v2  ;;  %v189_v20 = vmin.f32 %v181_v9, %v165_v7  ;;  %v162_v24 = vld [vmem:[%s821_s24 + $0x39] sm:$0xff]  ;;  %v852_v26 = vmax.f32 %v181_v9, %v165_v7  ;;  %v161_v31 = vld [vmem:[%s821_s24 + $0x31] sm:$0xff] }
  0x22   : > { %v168_v12 = vld [vmem:[%s821_s24 + $0x22] sm:$0xff]  ;;  %v838_v14 = vmin.f32 %v152_v10, %v160_v11  ;;  %v184_v15 = vmax.f32 %v152_v10, %v160_v11  ;;  %v170_v25 = vld [vmem:[%s821_s24 + $0x3a] sm:$0xff]  ;;  %v186_v29 = vmax.f32 %v154_v23, %v162_v24  ;;  %v169_v32 = vld [vmem:[%s821_s24 + $0x32] sm:$0xff]  ;;  %v190_v34 = vmin.f32 %v847_v22, %v843_v18  ;;  %p669_p0 = pneg %p668_p13  ;;  %p675_p3 = por %p674_p2, %p673_p1 }
  0x23   : > { %v856_v27 = vmin.f32 %v826_v3, %v836_v13  ;;  %v862_v33 = vmin.f32 %v831_v8, %v189_v20  ;;  %v185_v35 = vmax.f32 %v153_v30, %v161_v31  ;;  %v156_v36 = vld [vmem:[%s821_s24 + $0x50] sm:$0xff]  ;;  %v178_v39 = vmin.f32 %v154_v23, %v162_v24  ;;  %v155_v42 = vld [vmem:[%s821_s24 + $0x48] sm:$0xff] }
  0x24   : > { %v192_v28 = vmin.f32 %v184_v15, %v168_v12  ;;  %v164_v37 = vld [vmem:[%s821_s24 + $0x51] sm:$0xff]  ;;  %v194_v40 = vmin.f32 %v186_v29, %v170_v25  ;;  %v163_v43 = vld [vmem:[%s821_s24 + $0x49] sm:$0xff]  ;;  %v877_v44 = vmin.f32 %v174_v21, %v190_v34  ;;  %v177_v45 = vmin.f32 %v153_v30, %v161_v31  ;;  %p676_p5 = pnand %p675_p3, %p669_p0 }
  0x25   : > { %233 = vrot.lane.b32.xlu1 %v856_v27, %s746_s25  ;;  %v188_v41 = vmax.f32 %v156_v36, %v164_v37  ;;  %229 = vrot.lane.b32.xlu0 %v862_v33, %s746_s25  ;;  %v193_v46 = vmin.f32 %v185_v35, %v169_v32  ;;  %v172_v47 = vld [vmem:[%s821_s24 + $0x52] sm:$0xff]  ;;  %v187_v48 = vmax.f32 %v155_v42, %v163_v43  ;;  %v171_v49 = vld [vmem:[%s821_s24 + $0x4a] sm:$0xff] }
  0x26   : > { %v871_v38 = vmin.f32 %v838_v14, %v192_v28  ;;  %v883_v50 = vmin.f32 %v178_v39, %v194_v40  ;;  %v180_v51 = vmin.f32 %v156_v36, %v164_v37  ;;  %v179_v54 = vmin.f32 %v155_v42, %v163_v43 }
  0x27   : > { %v196_v52 = vmin.f32 %v188_v41, %v172_v47  ;;  %v887_v53 = vmin.f32 %v177_v45, %v193_v46  ;;  %v195_v55 = vmin.f32 %v187_v48, %v171_v49  ;;  %v889_v56 = vmax.f32 %v184_v15, %v168_v12 }
  0x28   : > { %v891_v57 = vmax.f32 %v186_v29, %v170_v25  ;;  %v893_v58 = vmax.f32 %v185_v35, %v169_v32  ;;  %v895_v59 = vmax.f32 %v188_v41, %v172_v47  ;;  %v897_v60 = vmax.f32 %v187_v48, %v171_v49 }
  0x29   : > { %235 = vrot.lane.b32.xlu1 %v871_v38, %s746_s25  ;;  %231 = vrot.lane.b32.xlu0 %v877_v44, %s746_s25  ;;  %v901_v61 = vmin.f32 %v180_v51, %v196_v52  ;;  %v905_v62 = vmin.f32 %v179_v54, %v195_v55  ;;  %v918_v63 = vmax.f32 %v831_v8, %v189_v20 }
  0x2a   : > { %1223 = vst [vmem:[#allocation5_spill] sm:$0xff] %v891_v57  ;;  %1224 = vst [vmem:[#allocation6_spill] sm:$0xff] %v893_v58  ;;  %v926_v0 = vmax.f32 %v826_v3, %v836_v13  ;;  %v930_v1 = vmax.f32 %v174_v21, %v190_v34  ;;  %v934_v2 = vmax.f32 %v177_v45, %v193_v46 }
  0x2b   : > { %1225 = vst [vmem:[#allocation7_spill] sm:$0xff] %v895_v59  ;;  %1226 = vst [vmem:[#allocation8_spill] sm:$0xff] %v897_v60  ;;  %v939_v4 = vmax.f32 %v838_v14, %v192_v28  ;;  %v943_v3 = vmax.f32 %v179_v54, %v195_v55  ;;  %v947_v5 = vmax.f32 %v178_v39, %v194_v40 }
  0x2c   : > { %v953_v6 = vmax.f32 %v180_v51, %v196_v52  ;;  %v979_v7 = vmax.f32 %v847_v22, %v843_v18 }
  0x2d   : > { %239 = vrot.lane.b32.xlu1 %v883_v50, %s746_s25  ;;  %237 = vrot.lane.b32.xlu0 %v887_v53, %s746_s25 }
  0x31   : > { %243 = vrot.lane.b32.xlu1 %v901_v61, %s746_s25  ;;  %241 = vrot.lane.b32.xlu0 %v905_v62, %s746_s25 }
  0x35   : > { %263 = vrot.lane.b32.xlu1 %v877_v44, %s747_s26  ;;  %261 = vrot.lane.b32.xlu0 %v862_v33, %s747_s26 }
  0x39   : > { %267 = vrot.lane.b32.xlu1 %v871_v38, %s747_s26  ;;  %265 = vrot.lane.b32.xlu0 %v856_v27, %s747_s26 }
  0x3d   : > { %301 = vrot.lane.b32.xlu1 %v918_v63, %s746_s25  ;;  %269 = vrot.lane.b32.xlu0 %v887_v53, %s747_s26 }
  0x41   : > { %305 = vrot.lane.b32.xlu1 %v926_v0, %s746_s25  ;;  %303 = vrot.lane.b32.xlu0 %v930_v1, %s746_s25 }
  0x45   : > { %309 = vrot.lane.b32.xlu1 %v934_v2, %s746_s25  ;;  %307 = vrot.lane.b32.xlu0 %v939_v4, %s746_s25 }
  0x49   : > { %313 = vrot.lane.b32.xlu1 %v943_v3, %s746_s25  ;;  %311 = vrot.lane.b32.xlu0 %v947_v5, %s746_s25 }
  0x4d   : > { %341 = vrot.lane.b32.xlu1 %v918_v63, %s747_s26  ;;  %315 = vrot.lane.b32.xlu0 %v953_v6, %s746_s25 }
  0x51   : > { %345 = vrot.lane.b32.xlu1 %v926_v0, %s747_s26  ;;  %343 = vrot.lane.b32.xlu0 %v930_v1, %s747_s26 }
  0x55   : > { %349 = vrot.lane.b32.xlu1 %v934_v2, %s747_s26  ;;  %347 = vrot.lane.b32.xlu0 %v939_v4, %s747_s26 }
  0x59   : > { %353 = vrot.lane.b32.xlu1 %v943_v3, %s747_s26  ;;  %351 = vrot.lane.b32.xlu0 %v947_v5, %s747_s26 }
  0x5d   : > { %271 = vrot.lane.b32.xlu1 %v883_v50, %s747_s26  ;;  %355 = vrot.lane.b32.xlu0 %v953_v6, %s747_s26 }
  0x61   : > { %275 = vrot.lane.b32.xlu1 %v901_v61, %s747_s26  ;;  %273 = vrot.lane.b32.xlu0 %v905_v62, %s747_s26 }
  0x65   : > { %391 = vrot.lane.b32.xlu1 %v979_v7, %s746_s25  ;;  %389 = vrot.lane.b32.xlu0 %v852_v26, %s746_s25 }
  0x69   : > { %395 = vrot.lane.b32.xlu1 %v889_v56, %s746_s25  ;;  %393 = vrot.lane.b32.xlu0 %v845_v19, %s746_s25 }
  0x6d   : > { %399 = vrot.lane.b32.xlu1 %v891_v57, %s746_s25  ;;  %397 = vrot.lane.b32.xlu0 %v893_v58, %s746_s25 }
  0x71   : > { %403 = vrot.lane.b32.xlu1 %v895_v59, %s746_s25  ;;  %401 = vrot.lane.b32.xlu0 %v897_v60, %s746_s25 }
  0x75   : > { %423 = vrot.lane.b32.xlu1 %v979_v7, %s747_s26  ;;  %421 = vrot.lane.b32.xlu0 %v852_v26, %s747_s26 }
  0x79   : > { %427 = vrot.lane.b32.xlu1 %v889_v56, %s747_s26  ;;  %425 = vrot.lane.b32.xlu0 %v845_v19, %s747_s26 }
  0x7d   : > { %431 = vrot.lane.b32.xlu1 %v891_v57, %s747_s26  ;;  %429 = vrot.lane.b32.xlu0 %v893_v58, %s747_s26 }
  0x81   : > { %435 = vrot.lane.b32.xlu1 %v895_v59, %s747_s26  ;;  %433 = vrot.lane.b32.xlu0 %v897_v60, %s747_s26 }
  0x97   : > { %v234_v8 = vpop.permute.xlu1 %233  ;;  %v230_v9 = vpop.permute.xlu0 %229 }
  0x98   : > { %v255_v52 = vmax.f32 %v856_v27, %v234_v8  ;;  %v253_v54 = vmax.f32 %v862_v33, %v230_v9 }
  0x9b   : > { %v236_v10 = vpop.permute.xlu1 %235  ;;  %v232_v11 = vpop.permute.xlu0 %231 }
  0x9c   : > { %v256_v59 = vmax.f32 %v871_v38, %v236_v10 }
  0x9f   : > { %v1015_v12 = vpop.permute.xlu1 %239  ;;  %v238_v13 = vpop.permute.xlu0 %237 }
  0xa0   : > { %v257_v57 = vmax.f32 %v887_v53, %v238_v13 }
  0xa3   : > { %v1017_v14 = vpop.permute.xlu1 %243  ;;  %v1019_v15 = vpop.permute.xlu0 %241 }
  0xa4   : > { %v260_v27 = vmax.f32 %v901_v61, %v1017_v14  ;;  %v259_v38 = vmax.f32 %v905_v62, %v1019_v15  ;;  %v1236_v15 = vld [vmem:[#allocation8_spill] sm:$0xff] }
  0xa7   : > { %v264_v16 = vpop.permute.xlu1 %263  ;;  %v262_v17 = vpop.permute.xlu0 %261 }
  0xa8   : > { %v285_v10 = vmax.f32 %v253_v54, %v262_v17 }
  0xab   : > { %v268_v18 = vpop.permute.xlu1 %267  ;;  %v266_v20 = vpop.permute.xlu0 %265 }
  0xaf   : > { %v302_v21 = vpop.permute.xlu1 %301  ;;  %v270_v22 = vpop.permute.xlu0 %269 }
  0xb0   : > { %v333_v55 = vmax.f32 %v918_v63, %v302_v21  ;;  %v325_v53 = vmin.f32 %v918_v63, %v302_v21 }
  0xb3   : > { %v1021_v23 = vpop.permute.xlu1 %305  ;;  %v304_v24 = vpop.permute.xlu0 %303 }
  0xb4   : > { %v334_v51 = vmax.f32 %v930_v1, %v304_v24  ;;  %v335_v33 = vmax.f32 %v926_v0, %v1021_v23 }
  0xb7   : > { %v1023_v25 = vpop.permute.xlu1 %309  ;;  %v1025_v28 = vpop.permute.xlu0 %307 }
  0xb8   : > { %v337_v63 = vmax.f32 %v934_v2, %v1023_v25 }
  0xbb   : > { %v1027_v29 = vpop.permute.xlu1 %313  ;;  %v1029_v30 = vpop.permute.xlu0 %311 }
  0xbc   : > { %v338_v21 = vmax.f32 %v947_v5, %v1029_v30 }
  0xbf   : > { %v342_v31 = vpop.permute.xlu1 %341  ;;  %v1031_v32 = vpop.permute.xlu0 %315 }
  0xc0   : > { %v365_v8 = vmin.f32 %v333_v55, %v342_v31  ;;  %v1076_v31 = vmax.f32 %v255_v52, %v266_v20  ;;  %v330_v20 = vmin.f32 %v947_v5, %v1029_v30 }
  0xc2   : > { %v373_v17 = vmax.f32 %v325_v53, %v365_v8 }
  0xc3   : > { %v346_v34 = vpop.permute.xlu1 %345  ;;  %v344_v35 = vpop.permute.xlu0 %343 }
  0xc4   : > { %v366_v58 = vmin.f32 %v334_v51, %v344_v35  ;;  %v1078_v35 = vmax.f32 %v257_v57, %v270_v22  ;;  %v328_v57 = vmin.f32 %v939_v4, %v1025_v28  ;;  %v461_v51 = vmax.f32 %v285_v10, %v373_v17 }
  0xc5   : > { %v453_v54 = vmin.f32 %v285_v10, %v373_v17 }
  0xc7   : > { %v350_v36 = vpop.permute.xlu1 %349  ;;  %v348_v37 = vpop.permute.xlu0 %347 }
  0xcb   : > { %v1033_v39 = vpop.permute.xlu1 %353  ;;  %v1035_v40 = vpop.permute.xlu0 %351 }
  0xcc   : > { %1227 = vst [vmem:[#allocation9_spill] sm:$0xff] %v1033_v39  ;;  %v370_v30 = vmin.f32 %v338_v21, %v1035_v40 }
  0xce   : > { %v378_v10 = vmax.f32 %v330_v20, %v370_v30 }
  0xcf   : > { %v1037_v41 = vpop.permute.xlu1 %271  ;;  %v1039_v42 = vpop.permute.xlu0 %355 }
  0xd3   : > { %v1041_v43 = vpop.permute.xlu1 %275  ;;  %v1043_v45 = vpop.permute.xlu0 %273 }
  0xd4   : > { %1228 = vst [vmem:[#allocation10_spill] sm:$0xff] %v1041_v43  ;;  %1229 = vst [vmem:[#allocation11_spill] sm:$0xff] %v1043_v45  ;;  %v254_v45 = vmax.f32 %v877_v44, %v232_v11  ;;  %v258_v43 = vmax.f32 %v883_v50, %v1015_v12  ;;  %v326_v44 = vmin.f32 %v930_v1, %v304_v24 }
  0xd5   : > { %v336_v50 = vmax.f32 %v939_v4, %v1025_v28  ;;  %v1071_v11 = vmax.f32 %v256_v59, %v268_v18  ;;  %v367_v12 = vmin.f32 %v335_v33, %v346_v34  ;;  %v327_v24 = vmin.f32 %v926_v0, %v1021_v23 }
  0xd6   : > { %v286_v9 = vmax.f32 %v254_v45, %v264_v16  ;;  %v374_v16 = vmax.f32 %v326_v44, %v366_v58  ;;  %v329_v59 = vmin.f32 %v934_v2, %v1023_v25  ;;  %v331_v58 = vmin.f32 %v943_v3, %v1027_v29 }
  0xd7   : > { %v392_v46 = vpop.permute.xlu1 %391  ;;  %v390_v47 = vpop.permute.xlu0 %389  ;;  %v368_v45 = vmin.f32 %v336_v50, %v348_v37  ;;  %v339_v18 = vmax.f32 %v943_v3, %v1027_v29  ;;  %v375_v2 = vmax.f32 %v327_v24, %v367_v12  ;;  %v332_v4 = vmin.f32 %v953_v6, %v1031_v32 }
  0xd8   : > { %v414_v0 = vmin.f32 %v979_v7, %v392_v46  ;;  %v413_v22 = vmin.f32 %v852_v26, %v390_v47  ;;  %v462_v34 = vmax.f32 %v286_v9, %v374_v16  ;;  %v340_v7 = vmax.f32 %v953_v6, %v1031_v32 }
  0xd9   : > { %v376_v25 = vmax.f32 %v328_v57, %v368_v45  ;;  %v369_v46 = vmin.f32 %v337_v63, %v350_v36  ;;  %v454_v5 = vmin.f32 %v286_v9, %v374_v16  ;;  %v463_v44 = vmax.f32 %v1076_v31, %v375_v2  ;;  %v1231_v16 = vld [vmem:[#allocation9_spill] sm:$0xff] }
  0xda   : > { %v290_v6 = vmax.f32 %v258_v43, %v1037_v41  ;;  %v372_v12 = vmin.f32 %v340_v7, %v1039_v42  ;;  %v455_v43 = vmin.f32 %v1076_v31, %v375_v2  ;;  %v371_v45 = vmin.f32 %v339_v18, %v1231_v16 }
  0xdb   : > { %v1045_v48 = vpop.permute.xlu1 %395  ;;  %v1047_v49 = vpop.permute.xlu0 %393  ;;  %v464_v9 = vmax.f32 %v1071_v11, %v376_v25  ;;  %v377_v40 = vmax.f32 %v329_v59, %v369_v46  ;;  %v456_v53 = vmin.f32 %v1071_v11, %v376_v25  ;;  %v1232_v11 = vld [vmem:[#allocation6_spill] sm:$0xff]  ;;  %v1234_v20 = vld [vmem:[#allocation11_spill] sm:$0xff] }
  0xdc   : > { %v416_v26 = vmin.f32 %v889_v56, %v1045_v48  ;;  %v415_v55 = vmin.f32 %v845_v19, %v1047_v49  ;;  %v1230_v19 = vld [vmem:[#allocation5_spill] sm:$0xff]  ;;  %v1233_v63 = vld [vmem:[#allocation10_spill] sm:$0xff]  ;;  %v1235_v25 = vld [vmem:[#allocation7_spill] sm:$0xff]  ;;  %v379_v62 = vmax.f32 %v331_v58, %v371_v45 }
  0xdd   : > { %v292_v17 = vmax.f32 %v260_v27, %v1233_v63  ;;  %v465_v21 = vmax.f32 %v1078_v35, %v377_v40  ;;  %v457_v14 = vmin.f32 %v1078_v35, %v377_v40 }
  0xdf   : > { %v1053_v60 = vpop.permute.xlu1 %399  ;;  %v1059_v39 = vpop.permute.xlu0 %397 }
  0xe0   : > { %v418_v49 = vmin.f32 %v1230_v19, %v1053_v60  ;;  %v417_v24 = vmin.f32 %v1232_v11, %v1059_v39  ;;  %v466_v60 = vmax.f32 %v290_v6, %v378_v10  ;;  %v291_v39 = vmax.f32 %v259_v38, %v1234_v20 }
  0xe2   : > { %v467_v46 = vmax.f32 %v291_v39, %v379_v62  ;;  %v459_v58 = vmin.f32 %v291_v39, %v379_v62 }
  0xe3   : > { %v1074_v13 = vpop.permute.xlu1 %403  ;;  %v1080_v1 = vpop.permute.xlu0 %401 }
  0xe4   : > { %v419_v27 = vmin.f32 %v1236_v15, %v1080_v1 }
  0xe7   : > { %v424_v23 = vpop.permute.xlu1 %423  ;;  %v422_v37 = vpop.permute.xlu0 %421 }
  0xe8   : > { %v446_v28 = vmin.f32 %v414_v0, %v424_v23  ;;  %v445_v52 = vmin.f32 %v413_v22, %v422_v37  ;;  %v458_v22 = vmin.f32 %v290_v6, %v378_v10  ;;  %v380_v23 = vmax.f32 %v332_v4, %v372_v12 }
  0xea   : > { %v470_v47 = vmin.f32 %v462_v34, %v446_v28  ;;  %v469_v33 = vmin.f32 %v461_v51, %v445_v52  ;;  %v420_v28 = vmin.f32 %v1235_v25, %v1074_v13  ;;  %v468_v4 = vmax.f32 %v292_v17, %v380_v23 }
  0xeb   : > { %v428_v8 = vpop.permute.xlu1 %427  ;;  %v426_v50 = vpop.permute.xlu0 %425  ;;  %v460_v29 = vmin.f32 %v292_v17, %v380_v23 }
  0xec   : > { %v478_v32 = vmax.f32 %v454_v5, %v470_v47  ;;  %v448_v36 = vmin.f32 %v416_v26, %v428_v8  ;;  %v477_v56 = vmax.f32 %v453_v54, %v469_v33  ;;  %v447_v48 = vmin.f32 %v415_v55, %v426_v50 }
  0xee   : > { %487 = vst.msk [vmem:[%s1119_s29 + $0x8] sm:$0xff] %vm485_vm0, %v478_v32  ;;  %v472_v41 = vmin.f32 %v464_v9, %v448_v36  ;;  %486 = vst.msk [vmem:[%s1119_s29] sm:$0xff] %vm485_vm0, %v477_v56  ;;  %v471_v42 = vmin.f32 %v463_v44, %v447_v48 }
  0xef   : > { %v432_v59 = vpop.permute.xlu1 %431  ;;  %v430_v31 = vpop.permute.xlu0 %429 }
  0xf0   : > { %v480_v57 = vmax.f32 %v456_v53, %v472_v41  ;;  %v450_v0 = vmin.f32 %v418_v49, %v432_v59  ;;  %v479_v18 = vmax.f32 %v455_v43, %v471_v42  ;;  %v449_v2 = vmin.f32 %v417_v24, %v430_v31 }
  0xf2   : > { %489 = vst.msk [vmem:[%s1119_s29 + $0x18] sm:$0xff] %vm485_vm0, %v480_v57  ;;  %v474_v61 = vmin.f32 %v466_v60, %v450_v0  ;;  %488 = vst.msk [vmem:[%s1119_s29 + $0x10] sm:$0xff] %vm485_vm0, %v479_v18  ;;  %v473_v38 = vmin.f32 %v465_v21, %v449_v2 }
  0xf3   : > { %v436_v13 = vpop.permute.xlu1 %435  ;;  %v434_v7 = vpop.permute.xlu0 %433 }
  0xf4   : > { %v482_v34 = vmax.f32 %v458_v22, %v474_v61  ;;  %v452_v37 = vmin.f32 %v420_v28, %v436_v13  ;;  %v481_v35 = vmax.f32 %v457_v14, %v473_v38  ;;  %v451_v3 = vmin.f32 %v419_v27, %v434_v7 }
  0xf6   : > { %491 = vst.msk [vmem:[%s1119_s29 + $0x28] sm:$0xff] %vm485_vm0, %v482_v34  ;;  %v476_v1 = vmin.f32 %v468_v4, %v452_v37  ;;  %490 = vst.msk [vmem:[%s1119_s29 + $0x20] sm:$0xff] %vm485_vm0, %v481_v35  ;;  %v475_v51 = vmin.f32 %v467_v46, %v451_v3 }
  0xf8   : > { %v484_v52 = vmax.f32 %v460_v29, %v476_v1  ;;  %v483_v5 = vmax.f32 %v459_v58, %v475_v51 }
  0xfa   : > { %493 = vst.msk [vmem:[%s1119_s29 + $0x38] sm:$0xff] %vm485_vm0, %v484_v52  ;;  %492 = vst.msk [vmem:[%s1119_s29 + $0x30] sm:$0xff] %vm485_vm0, %v483_v5 }
  0xfb   : > { %679 = shalt.err (!%p676_p5)
}
  0xfc   : > { %s680_s20 = scalar_lea.hbm %s1159_s5, 1024  ;;  %s684_s23 = scalar_lea.hbm %s1216_s1, 2048 }
  0xfd   : > { %p681_p6 = scmp.ne.s32.totalorder %s1159_s5, %s680_s20  ;;  %p685_p10 = scmp.lt.u32.totalorder %s1159_s5, %s1216_s1 }
  0xfe   : > { %p686_p11 = scmp.lt.u32.totalorder %s684_s23, %s680_s20  ;;  %p688_p13 = scmp.lt.u32.totalorder %s680_s20, %s1159_s5 }
  0xff   : > { %p682_p7 = pnand %p681_p6, %p801_p4 }
 0x100   : > { %p687_p12 = por %p686_p11, %p685_p10 }
 0x101   : > { %p683_p9 = pneg %p682_p7 }
 0x102   : > { %p689_p0 = por %p688_p13, %p687_p12 }
 0x104   : > { %p690_p1 = pnand %p689_p0, %p683_p9 }
 0x106   : > { %693 = shalt.err (!%p690_p1)
}
 0x107   : > { %s749_s26 = smov 128   ;;  %s750_s27 = smov 8  }
 0x108   : > { %607 = dma.vmem_to_hbm [thread:$0]  (%p801_p4), %s1161_s2, 1024, %s1159_s5, %s1169_s9, %s749_s26, %s749_s26, %s750_s27  }
 0x109 PF: > { %p613_p2 = scmp.ge.s32.totalorder %s744_s11, 2  ;;  %s526_s28 = sand.u32 1, %s724_s6  }
 0x10a   : > { %s527_s29 = scalar_lea.sflag [#allocation3], %s526_s28 }
 0x10b   : > { %p610_p3 = pnand %p613_p2, %p808_p8 }
 0x10d   : > { %719 = dma.done.wait (!%p610_p3), %s527_s29, 1024  }
 0x10e   : > { %721 = vsyncadd (!%p610_p3), %s527_s29, 4294966272  ;;  %s14_s11 = sadd.s32 1, %s744_s11   ;;  %s1237_s6 = smov %s728_s7 }
 0x10f   : > { %p11_p5 = scmp.ge.s32.totalorder %s14_s11, 4   ;;  %s1238_s7 = smov %s732_s8 }
 0x110   : > { %s1239_s8 = smov %s814_s19  ;;  %s1240_s9 = smov %s740_s10 }
 0x111   : > { %s1241_s10 = smov %s1243_s14  ;;  %13 = sbr.rel (!%p11_p5) target bundleno = 4 (0x4), region = 59 }
 0x118   :  { %532 = vsyncpa [#allocation3], 1 }
 0x119   :  { %534 = vsyncpa [#allocation3 + $0x1], 1 }

</bundles_post_ra>
